<compile_context>
chip_gen: v6e
topology: v6e:2x2x1
jax: 0.10.0
libtpu: 0.0.40
codegen_flags: <defaults>
</compile_context>

<pallas_src>
import jax
import jax.numpy as jnp
import numpy as np
from jax import lax
from jax.experimental import pallas as pl
from jax.experimental.pallas import tpu as pltpu

# ---- small, deterministic config (consistent with GPTNeoXAttention.__init__) ----
NUM_HEADS = 4
HIDDEN = 64
HEAD_SIZE = HIDDEN // NUM_HEADS              # 16
ROTARY_PCT = 0.5
ROTARY_NDIMS = int(HEAD_SIZE * ROTARY_PCT)   # 8
ROTARY_BASE = 10000.0
BATCH = 2
SEQ = 8

_INV_NORM = 1.0 / float(HEAD_SIZE ** 0.5)    # 0.25 (exact power of two)


def _attention_kernel(x_ref, cos_ref, sin_ref, rot_ref, bias_ref, o_ref):
    """Whole-problem kernel: all batches, heads and positions in one invocation."""
    x = x_ref[...]        # (B*S, 3*HIDDEN); rows = b*S + s, cols head-major [q|k|v]
    cos = cos_ref[...]    # (B*S, HEAD_SIZE) cos on rotary dims, 1 on pass dims
    sin = sin_ref[...]    # (B*S, HEAD_SIZE) sin on rotary dims, 0 on pass dims
    rot = rot_ref[...]    # (HEAD_SIZE, HEAD_SIZE): x @ rot == rotate_half(x) on rotary dims
    bias = bias_ref[...]  # (B*S, B*S) combined causal + cross-batch + additive mask

    outs = []
    for h in range(NUM_HEADS):               # tiny static unrolled loop
        c0 = 3 * HEAD_SIZE * h
        q = x[:, c0:c0 + HEAD_SIZE]
        k = x[:, c0 + HEAD_SIZE:c0 + 2 * HEAD_SIZE]
        v = x[:, c0 + 2 * HEAD_SIZE:c0 + 3 * HEAD_SIZE]

        # NeoX rotary embedding, concatenate/slice free (padded cos/sin tables).
        q = q * cos + jnp.dot(q, rot, preferred_element_type=jnp.float32) * sin
        k = k * cos + jnp.dot(k, rot, preferred_element_type=jnp.float32) * sin

        # Fold 1/sqrt(head_size) into q before the matmul (exact: power of two).
        q = q * _INV_NORM

        # Scores over the flattened batch*seq axis; bias drives non-causal and
        # cross-batch entries to ~float32.min so their softmax weight is exactly 0.
        s = lax.dot_general(q, k, (((1,), (1,)), ((), ())),
                            preferred_element_type=jnp.float32)
        s = s + bias
        m = jnp.max(s, axis=-1, keepdims=True)
        p = jnp.exp(s - m)
        l = jnp.sum(p, axis=-1, keepdims=True)
        w = p * pl.reciprocal(l, approx=True)          # EUP slot, no S*S divides

        outs.append(jnp.dot(w, v, preferred_element_type=jnp.float32))

    out = jnp.concatenate(outs, axis=-1)               # (B*S, HIDDEN), lane-dense
    o_ref[...] = out.reshape(o_ref.shape).astype(o_ref.dtype)


def _rope_tables(S):
    """Padded cos/sin tables (full HEAD_SIZE) and the constant rotate_half matrix."""
    inv_freq = 1.0 / (ROTARY_BASE ** (
        jnp.arange(0, ROTARY_NDIMS, 2, dtype=jnp.float32) / ROTARY_NDIMS))
    t = jnp.arange(S, dtype=jnp.float32)
    freqs = jnp.einsum("i,j->ij", t, inv_freq)
    emb = jnp.concatenate([freqs, freqs], axis=-1)                        # (S, rot)
    pad1 = jnp.ones((S, HEAD_SIZE - ROTARY_NDIMS), jnp.float32)
    pad0 = jnp.zeros((S, HEAD_SIZE - ROTARY_NDIMS), jnp.float32)
    cos = jnp.concatenate([jnp.cos(emb), pad1], axis=-1)                  # (S, HEAD_SIZE)
    sin = jnp.concatenate([jnp.sin(emb), pad0], axis=-1)                  # (S, HEAD_SIZE)

    half = ROTARY_NDIMS // 2
    rmat = np.zeros((HEAD_SIZE, HEAD_SIZE), dtype=np.float32)
    for d in range(half):
        rmat[d + half, d] = -1.0          # out[d] = -x[d + half]
    for d in range(half, ROTARY_NDIMS):
        rmat[d - half, d] = 1.0           # out[d] =  x[d - half]
    return cos, sin, jnp.asarray(rmat)


@jax.jit
def gptneox_attention(qkv, attention_mask):
    """qkv: (B, S, 3*HIDDEN) f32; attention_mask: (B, 1, 1, S) additive f32."""
    B, S, _ = qkv.shape
    cos, sin, rmat = _rope_tables(S)
    cos_t = jnp.tile(cos, (B, 1))                                         # (B*S, HEAD_SIZE)
    sin_t = jnp.tile(sin, (B, 1))

    # Combined additive bias over the flattened batch*seq axis: causal mask,
    # cross-batch block mask, and the additive attention mask, built with a
    # single where (no -inf stacking; float32.min + (-1e4) stays finite).
    mask_value = float(jnp.finfo(jnp.float32).min)
    idx = jnp.arange(B * S)
    b_id, s_id = idx // S, idx % S
    allowed = (b_id[:, None] == b_id[None, :]) & (s_id[None, :] <= s_id[:, None])
    amask = attention_mask.reshape(B * S).astype(jnp.float32)
    bias = (jnp.where(allowed, 0.0, mask_value) + amask[None, :]).astype(jnp.float32)

    x2 = qkv.reshape(B * S, 3 * HIDDEN)       # free metadata reshape, no transposes

    vmem = pl.BlockSpec(memory_space=pltpu.MemorySpace.VMEM)
    out = pl.pallas_call(
        _attention_kernel,
        out_shape=jax.ShapeDtypeStruct((B, S, HIDDEN), qkv.dtype),
        in_specs=[vmem, vmem, vmem, vmem, vmem],
        out_specs=vmem,
    )(x2, cos_t, sin_t, rmat, bias)
    # TODO(synk): layer_past / use_cache KV-cache path, head_mask and
    # output_attentions (attn_weights) are not implemented (no-cache forward only).
    return out


def _reference(qkv, attention_mask):
    """Pure-JAX reference mirroring the PyTorch forward (for verification)."""
    B, S, _ = qkv.shape
    qkv4 = qkv.reshape(B, S, NUM_HEADS, 3 * HEAD_SIZE)
    q = jnp.transpose(qkv4[..., :HEAD_SIZE], (0, 2, 1, 3))
    k = jnp.transpose(qkv4[..., HEAD_SIZE:2 * HEAD_SIZE], (0, 2, 1, 3))
    v = jnp.transpose(qkv4[..., 2 * HEAD_SIZE:], (0, 2, 1, 3))

    inv_freq = 1.0 / (ROTARY_BASE ** (
        jnp.arange(0, ROTARY_NDIMS, 2, dtype=jnp.float32) / ROTARY_NDIMS))
    t = jnp.arange(S, dtype=jnp.float32)
    emb = jnp.concatenate([jnp.einsum("i,j->ij", t, inv_freq)] * 2, axis=-1)
    cos, sin = jnp.cos(emb), jnp.sin(emb)

    def rope(x):
        xr, xp = x[..., :ROTARY_NDIMS], x[..., ROTARY_NDIMS:]
        x1, x2 = xr[..., :ROTARY_NDIMS // 2], xr[..., ROTARY_NDIMS // 2:]
        rot = jnp.concatenate([-x2, x1], axis=-1)
        return jnp.concatenate([xr * cos + rot * sin, xp], axis=-1)

    q, k = rope(q), rope(k)
    scores = jnp.einsum("bhqd,bhkd->bhqk", q, k) / jnp.sqrt(jnp.float32(HEAD_SIZE))
    causal = jnp.tril(jnp.ones((S, S), dtype=bool))
    scores = jnp.where(causal, scores, jnp.finfo(jnp.float32).min)
    scores = scores + attention_mask
    w = jax.nn.softmax(scores, axis=-1)
    out = jnp.einsum("bhqk,bhkd->bhqd", w, v)
    return jnp.transpose(out, (0, 2, 1, 3)).reshape(B, S, HIDDEN)


if __name__ == "__main__":
    key = jax.random.PRNGKey(0)
    k1, _ = jax.random.split(key)
    qkv = jax.random.normal(k1, (BATCH, SEQ, 3 * HIDDEN), dtype=jnp.float32)

    # Additive attention mask (B,1,1,S): batch 0 attends to all keys; batch 1
    # has the last two key positions padded out.
    pad = jnp.array([[0, 0, 0, 0, 0, 0, 0, 0],
                     [0, 0, 0, 0, 0, 0, 1, 1]], dtype=jnp.float32)
    attention_mask = (pad * -10000.0).reshape(BATCH, 1, 1, SEQ)

    out = jax.block_until_ready(gptneox_attention(qkv, attention_mask))
    ref = _reference(qkv, attention_mask)

    assert out.shape == (BATCH, SEQ, HIDDEN)
    # Tolerance accounts for the approximate (EUP) reciprocal used in the
    # softmax normalisation; everything else is plain f32 math.
    assert jnp.allclose(out, ref, atol=5e-3, rtol=5e-3), "mismatch vs reference"
    print("KERNEL_OK")
</pallas_src>

<mosaic_0001>
module attributes {stable_mosaic.version = 11 : i64} {
  func.func @_attention_kernel(%arg0: memref<16x192xf32, #tpu.memory_space<vmem>>, %arg1: memref<16x16xf32, #tpu.memory_space<vmem>>, %arg2: memref<16x16xf32, #tpu.memory_space<vmem>>, %arg3: memref<16x16xf32, #tpu.memory_space<vmem>>, %arg4: memref<16x16xf32, #tpu.memory_space<vmem>>, %arg5: memref<2x8x64xf32, #tpu.memory_space<vmem>>) attributes {dimension_semantics = [], scalar_prefetch = 0 : i64, scratch_operands = 0 : i64, tpu.core_type = #tpu.core_type<tc>} {
    %c0 = arith.constant 0 : index
    %c0_0 = arith.constant 0 : index
    %0 = vector.load %arg0[%c0, %c0_0] : memref<16x192xf32, #tpu.memory_space<vmem>>, vector<16x192xf32>
    %c0_1 = arith.constant 0 : index
    %c0_2 = arith.constant 0 : index
    %1 = vector.load %arg1[%c0_1, %c0_2] : memref<16x16xf32, #tpu.memory_space<vmem>>, vector<16x16xf32>
    %c0_3 = arith.constant 0 : index
    %c0_4 = arith.constant 0 : index
    %2 = vector.load %arg2[%c0_3, %c0_4] : memref<16x16xf32, #tpu.memory_space<vmem>>, vector<16x16xf32>
    %c0_5 = arith.constant 0 : index
    %c0_6 = arith.constant 0 : index
    %3 = vector.load %arg3[%c0_5, %c0_6] : memref<16x16xf32, #tpu.memory_space<vmem>>, vector<16x16xf32>
    %c0_7 = arith.constant 0 : index
    %c0_8 = arith.constant 0 : index
    %4 = vector.load %arg4[%c0_7, %c0_8] : memref<16x16xf32, #tpu.memory_space<vmem>>, vector<16x16xf32>
    %5 = vector.extract_strided_slice %0 {offsets = [0, 0], sizes = [16, 16], strides = [1, 1]} : vector<16x192xf32> to vector<16x16xf32>
    %6 = vector.extract_strided_slice %0 {offsets = [0, 16], sizes = [16, 16], strides = [1, 1]} : vector<16x192xf32> to vector<16x16xf32>
    %7 = vector.extract_strided_slice %0 {offsets = [0, 32], sizes = [16, 16], strides = [1, 1]} : vector<16x192xf32> to vector<16x16xf32>
    %8 = arith.mulf %5, %1 : vector<16x16xf32>
    %cst = arith.constant dense<0.000000e+00> : vector<16x16xf32>
    %9 = tpu.matmul %5, %3, %cst {dimension_numbers = #tpu.dot_dimension_numbers<[1], [0], [0], [1], [0, 0, 1, 1], [], []>} : vector<16x16xf32>, vector<16x16xf32>, vector<16x16xf32> -> vector<16x16xf32>
    %10 = arith.mulf %9, %2 : vector<16x16xf32>
    %11 = arith.addf %8, %10 : vector<16x16xf32>
    %12 = arith.mulf %6, %1 : vector<16x16xf32>
    %cst_9 = arith.constant dense<0.000000e+00> : vector<16x16xf32>
    %13 = tpu.matmul %6, %3, %cst_9 {dimension_numbers = #tpu.dot_dimension_numbers<[1], [0], [0], [1], [0, 0, 1, 1], [], []>} : vector<16x16xf32>, vector<16x16xf32>, vector<16x16xf32> -> vector<16x16xf32>
    %14 = arith.mulf %13, %2 : vector<16x16xf32>
    %15 = arith.addf %12, %14 : vector<16x16xf32>
    %cst_10 = arith.constant 2.500000e-01 : f32
    %16 = vector.broadcast %cst_10 : f32 to vector<16x16xf32>
    %17 = arith.mulf %11, %16 : vector<16x16xf32>
    %cst_11 = arith.constant dense<0.000000e+00> : vector<16x16xf32>
    %18 = tpu.matmul %17, %15, %cst_11 {dimension_numbers = #tpu.dot_dimension_numbers<[1], [1], [0], [0], [0, 0, 1, 0], [], []>} : vector<16x16xf32>, vector<16x16xf32>, vector<16x16xf32> -> vector<16x16xf32>
    %19 = arith.addf %18, %4 : vector<16x16xf32>
    %cst_12 = arith.constant dense<0xFF800000> : vector<16xf32>
    %20 = vector.multi_reduction <maximumf>, %19, %cst_12 [1] : vector<16x16xf32> to vector<16xf32>
    %21 = vector.shape_cast %20 : vector<16xf32> to vector<16x1xf32>
    %22 = vector.broadcast %21 : vector<16x1xf32> to vector<16x16xf32>
    %23 = arith.subf %19, %22 : vector<16x16xf32>
    %24 = math.exp %23 : vector<16x16xf32>
    %cst_13 = arith.constant dense<0.000000e+00> : vector<16xf32>
    %25 = vector.multi_reduction <add>, %24, %cst_13 [1] : vector<16x16xf32> to vector<16xf32>
    %26 = vector.shape_cast %25 : vector<16xf32> to vector<16x1xf32>
    %27 = tpu.reciprocal %26 {approx = true} : vector<16x1xf32> -> vector<16x1xf32>
    %28 = vector.broadcast %27 : vector<16x1xf32> to vector<16x16xf32>
    %29 = arith.mulf %24, %28 : vector<16x16xf32>
    %cst_14 = arith.constant dense<0.000000e+00> : vector<16x16xf32>
    %30 = tpu.matmul %29, %7, %cst_14 {dimension_numbers = #tpu.dot_dimension_numbers<[1], [0], [0], [1], [0, 0, 1, 1], [], []>} : vector<16x16xf32>, vector<16x16xf32>, vector<16x16xf32> -> vector<16x16xf32>
    %31 = vector.extract_strided_slice %0 {offsets = [0, 48], sizes = [16, 16], strides = [1, 1]} : vector<16x192xf32> to vector<16x16xf32>
    %32 = vector.extract_strided_slice %0 {offsets = [0, 64], sizes = [16, 16], strides = [1, 1]} : vector<16x192xf32> to vector<16x16xf32>
    %33 = vector.extract_strided_slice %0 {offsets = [0, 80], sizes = [16, 16], strides = [1, 1]} : vector<16x192xf32> to vector<16x16xf32>
    %34 = arith.mulf %31, %1 : vector<16x16xf32>
    %cst_15 = arith.constant dense<0.000000e+00> : vector<16x16xf32>
    %35 = tpu.matmul %31, %3, %cst_15 {dimension_numbers = #tpu.dot_dimension_numbers<[1], [0], [0], [1], [0, 0, 1, 1], [], []>} : vector<16x16xf32>, vector<16x16xf32>, vector<16x16xf32> -> vector<16x16xf32>
    %36 = arith.mulf %35, %2 : vector<16x16xf32>
    %37 = arith.addf %34, %36 : vector<16x16xf32>
    %38 = arith.mulf %32, %1 : vector<16x16xf32>
    %cst_16 = arith.constant dense<0.000000e+00> : vector<16x16xf32>
    %39 = tpu.matmul %32, %3, %cst_16 {dimension_numbers = #tpu.dot_dimension_numbers<[1], [0], [0], [1], [0, 0, 1, 1], [], []>} : vector<16x16xf32>, vector<16x16xf32>, vector<16x16xf32> -> vector<16x16xf32>
    %40 = arith.mulf %39, %2 : vector<16x16xf32>
    %41 = arith.addf %38, %40 : vector<16x16xf32>
    %cst_17 = arith.constant 2.500000e-01 : f32
    %42 = vector.broadcast %cst_17 : f32 to vector<16x16xf32>
    %43 = arith.mulf %37, %42 : vector<16x16xf32>
    %cst_18 = arith.constant dense<0.000000e+00> : vector<16x16xf32>
    %44 = tpu.matmul %43, %41, %cst_18 {dimension_numbers = #tpu.dot_dimension_numbers<[1], [1], [0], [0], [0, 0, 1, 0], [], []>} : vector<16x16xf32>, vector<16x16xf32>, vector<16x16xf32> -> vector<16x16xf32>
    %45 = arith.addf %44, %4 : vector<16x16xf32>
    %cst_19 = arith.constant dense<0xFF800000> : vector<16xf32>
    %46 = vector.multi_reduction <maximumf>, %45, %cst_19 [1] : vector<16x16xf32> to vector<16xf32>
    %47 = vector.shape_cast %46 : vector<16xf32> to vector<16x1xf32>
    %48 = vector.broadcast %47 : vector<16x1xf32> to vector<16x16xf32>
    %49 = arith.subf %45, %48 : vector<16x16xf32>
    %50 = math.exp %49 : vector<16x16xf32>
    %cst_20 = arith.constant dense<0.000000e+00> : vector<16xf32>
    %51 = vector.multi_reduction <add>, %50, %cst_20 [1] : vector<16x16xf32> to vector<16xf32>
    %52 = vector.shape_cast %51 : vector<16xf32> to vector<16x1xf32>
    %53 = tpu.reciprocal %52 {approx = true} : vector<16x1xf32> -> vector<16x1xf32>
    %54 = vector.broadcast %53 : vector<16x1xf32> to vector<16x16xf32>
    %55 = arith.mulf %50, %54 : vector<16x16xf32>
    %cst_21 = arith.constant dense<0.000000e+00> : vector<16x16xf32>
    %56 = tpu.matmul %55, %33, %cst_21 {dimension_numbers = #tpu.dot_dimension_numbers<[1], [0], [0], [1], [0, 0, 1, 1], [], []>} : vector<16x16xf32>, vector<16x16xf32>, vector<16x16xf32> -> vector<16x16xf32>
    %57 = vector.extract_strided_slice %0 {offsets = [0, 96], sizes = [16, 16], strides = [1, 1]} : vector<16x192xf32> to vector<16x16xf32>
    %58 = vector.extract_strided_slice %0 {offsets = [0, 112], sizes = [16, 16], strides = [1, 1]} : vector<16x192xf32> to vector<16x16xf32>
    %59 = vector.extract_strided_slice %0 {offsets = [0, 128], sizes = [16, 16], strides = [1, 1]} : vector<16x192xf32> to vector<16x16xf32>
    %60 = arith.mulf %57, %1 : vector<16x16xf32>
    %cst_22 = arith.constant dense<0.000000e+00> : vector<16x16xf32>
    %61 = tpu.matmul %57, %3, %cst_22 {dimension_numbers = #tpu.dot_dimension_numbers<[1], [0], [0], [1], [0, 0, 1, 1], [], []>} : vector<16x16xf32>, vector<16x16xf32>, vector<16x16xf32> -> vector<16x16xf32>
    %62 = arith.mulf %61, %2 : vector<16x16xf32>
    %63 = arith.addf %60, %62 : vector<16x16xf32>
    %64 = arith.mulf %58, %1 : vector<16x16xf32>
    %cst_23 = arith.constant dense<0.000000e+00> : vector<16x16xf32>
    %65 = tpu.matmul %58, %3, %cst_23 {dimension_numbers = #tpu.dot_dimension_numbers<[1], [0], [0], [1], [0, 0, 1, 1], [], []>} : vector<16x16xf32>, vector<16x16xf32>, vector<16x16xf32> -> vector<16x16xf32>
    %66 = arith.mulf %65, %2 : vector<16x16xf32>
    %67 = arith.addf %64, %66 : vector<16x16xf32>
    %cst_24 = arith.constant 2.500000e-01 : f32
    %68 = vector.broadcast %cst_24 : f32 to vector<16x16xf32>
    %69 = arith.mulf %63, %68 : vector<16x16xf32>
    %cst_25 = arith.constant dense<0.000000e+00> : vector<16x16xf32>
    %70 = tpu.matmul %69, %67, %cst_25 {dimension_numbers = #tpu.dot_dimension_numbers<[1], [1], [0], [0], [0, 0, 1, 0], [], []>} : vector<16x16xf32>, vector<16x16xf32>, vector<16x16xf32> -> vector<16x16xf32>
    %71 = arith.addf %70, %4 : vector<16x16xf32>
    %cst_26 = arith.constant dense<0xFF800000> : vector<16xf32>
    %72 = vector.multi_reduction <maximumf>, %71, %cst_26 [1] : vector<16x16xf32> to vector<16xf32>
    %73 = vector.shape_cast %72 : vector<16xf32> to vector<16x1xf32>
    %74 = vector.broadcast %73 : vector<16x1xf32> to vector<16x16xf32>
    %75 = arith.subf %71, %74 : vector<16x16xf32>
    %76 = math.exp %75 : vector<16x16xf32>
    %cst_27 = arith.constant dense<0.000000e+00> : vector<16xf32>
    %77 = vector.multi_reduction <add>, %76, %cst_27 [1] : vector<16x16xf32> to vector<16xf32>
    %78 = vector.shape_cast %77 : vector<16xf32> to vector<16x1xf32>
    %79 = tpu.reciprocal %78 {approx = true} : vector<16x1xf32> -> vector<16x1xf32>
    %80 = vector.broadcast %79 : vector<16x1xf32> to vector<16x16xf32>
    %81 = arith.mulf %76, %80 : vector<16x16xf32>
    %cst_28 = arith.constant dense<0.000000e+00> : vector<16x16xf32>
    %82 = tpu.matmul %81, %59, %cst_28 {dimension_numbers = #tpu.dot_dimension_numbers<[1], [0], [0], [1], [0, 0, 1, 1], [], []>} : vector<16x16xf32>, vector<16x16xf32>, vector<16x16xf32> -> vector<16x16xf32>
    %83 = vector.extract_strided_slice %0 {offsets = [0, 144], sizes = [16, 16], strides = [1, 1]} : vector<16x192xf32> to vector<16x16xf32>
    %84 = vector.extract_strided_slice %0 {offsets = [0, 160], sizes = [16, 16], strides = [1, 1]} : vector<16x192xf32> to vector<16x16xf32>
    %85 = vector.extract_strided_slice %0 {offsets = [0, 176], sizes = [16, 16], strides = [1, 1]} : vector<16x192xf32> to vector<16x16xf32>
    %86 = arith.mulf %83, %1 : vector<16x16xf32>
    %cst_29 = arith.constant dense<0.000000e+00> : vector<16x16xf32>
    %87 = tpu.matmul %83, %3, %cst_29 {dimension_numbers = #tpu.dot_dimension_numbers<[1], [0], [0], [1], [0, 0, 1, 1], [], []>} : vector<16x16xf32>, vector<16x16xf32>, vector<16x16xf32> -> vector<16x16xf32>
    %88 = arith.mulf %87, %2 : vector<16x16xf32>
    %89 = arith.addf %86, %88 : vector<16x16xf32>
    %90 = arith.mulf %84, %1 : vector<16x16xf32>
    %cst_30 = arith.constant dense<0.000000e+00> : vector<16x16xf32>
    %91 = tpu.matmul %84, %3, %cst_30 {dimension_numbers = #tpu.dot_dimension_numbers<[1], [0], [0], [1], [0, 0, 1, 1], [], []>} : vector<16x16xf32>, vector<16x16xf32>, vector<16x16xf32> -> vector<16x16xf32>
    %92 = arith.mulf %91, %2 : vector<16x16xf32>
    %93 = arith.addf %90, %92 : vector<16x16xf32>
    %cst_31 = arith.constant 2.500000e-01 : f32
    %94 = vector.broadcast %cst_31 : f32 to vector<16x16xf32>
    %95 = arith.mulf %89, %94 : vector<16x16xf32>
    %cst_32 = arith.constant dense<0.000000e+00> : vector<16x16xf32>
    %96 = tpu.matmul %95, %93, %cst_32 {dimension_numbers = #tpu.dot_dimension_numbers<[1], [1], [0], [0], [0, 0, 1, 0], [], []>} : vector<16x16xf32>, vector<16x16xf32>, vector<16x16xf32> -> vector<16x16xf32>
    %97 = arith.addf %96, %4 : vector<16x16xf32>
    %cst_33 = arith.constant dense<0xFF800000> : vector<16xf32>
    %98 = vector.multi_reduction <maximumf>, %97, %cst_33 [1] : vector<16x16xf32> to vector<16xf32>
    %99 = vector.shape_cast %98 : vector<16xf32> to vector<16x1xf32>
    %100 = vector.broadcast %99 : vector<16x1xf32> to vector<16x16xf32>
    %101 = arith.subf %97, %100 : vector<16x16xf32>
    %102 = math.exp %101 : vector<16x16xf32>
    %cst_34 = arith.constant dense<0.000000e+00> : vector<16xf32>
    %103 = vector.multi_reduction <add>, %102, %cst_34 [1] : vector<16x16xf32> to vector<16xf32>
    %104 = vector.shape_cast %103 : vector<16xf32> to vector<16x1xf32>
    %105 = tpu.reciprocal %104 {approx = true} : vector<16x1xf32> -> vector<16x1xf32>
    %106 = vector.broadcast %105 : vector<16x1xf32> to vector<16x16xf32>
    %107 = arith.mulf %102, %106 : vector<16x16xf32>
    %cst_35 = arith.constant dense<0.000000e+00> : vector<16x16xf32>
    %108 = tpu.matmul %107, %85, %cst_35 {dimension_numbers = #tpu.dot_dimension_numbers<[1], [0], [0], [1], [0, 0, 1, 1], [], []>} : vector<16x16xf32>, vector<16x16xf32>, vector<16x16xf32> -> vector<16x16xf32>
    %109 = tpu.concatenate %30, %56, %82, %108 in 1 : vector<16x16xf32>, vector<16x16xf32>, vector<16x16xf32>, vector<16x16xf32> -> vector<16x64xf32>
    %110 = vector.shape_cast %109 : vector<16x64xf32> to vector<2x8x64xf32>
    %c0_36 = arith.constant 0 : index
    %c0_37 = arith.constant 0 : index
    %c0_38 = arith.constant 0 : index
    %111 = vector.load %arg5[%c0_36, %c0_37, %c0_38] : memref<2x8x64xf32, #tpu.memory_space<vmem>>, vector<2x8x64xf32>
    tpu.vector_store %arg5[%c0_36, %c0_37, %c0_38], %110 {strides = array<i32>} : memref<2x8x64xf32, #tpu.memory_space<vmem>>, vector<2x8x64xf32>,
    return
  }
}

</mosaic_0001>

<bundles_post_ra>
// kernel: gptneox_attention.1
= control target key start
LH: loop header
LB: loop body
LE: loop exit
PB: predicated region body
PF: predicated region fallthrough
CT: control target
= control target key end

     0   :  { %s1985_s22 = smov 112   ;;  %s1986_s29 = smov 16   ;;  %s2355_s0 = inlined_call_operand.vmem [shape: f32[16,192], index: 0, kind: input, shape index: {}]   ;;  %s2356_s1 = inlined_call_operand.vmem [shape: f32[16,16], index: 1, kind: input, shape index: {}]   ;;  %s2357_s2 = inlined_call_operand.vmem [shape: f32[16,16], index: 2, kind: input, shape index: {}]   ;;  %s2358_s3 = inlined_call_operand.vmem [shape: f32[16,16], index: 3, kind: input, shape index: {}]   ;;  %s2359_s4 = inlined_call_operand.vmem [shape: f32[16,16], index: 4, kind: input, shape index: {}]   ;;  %s2360_s5 = inlined_call_operand.hbm [shape: f32[2,8,64], index: 5, kind: output, shape index: {}]  }
   0x1   :  { %v2028_v0 = vld [vmem:[%s2355_s0] sm:$0xff]  ;;  %v2033_v1 = vld [vmem:[%s2358_s3 + $0x8] sm:$0xff]  ;;  %v2051_v4 = vld [vmem:[%s2355_s0 + $0x10] sm:$0xff] }
   0x2   :  { %131 = vrot.lane.b32.xlu0 %v2028_v0, %s1985_s22  ;;  %1816 = vmatprep.subr.mxu1 %v2033_v1  ;;  %v2041_v2 = vld [vmem:[%s2358_s3] sm:$0xff]  ;;  %v2046_v3 = vld [vmem:[%s2356_s1 + $0x8] sm:$0xff] }
   0x3   :  { %1817 = vmatpush3.msra.mxu1 %v2033_v1  ;;  %125 = vrot.lane.b32.xlu1 %v2046_v3, %s1986_s29 }
   0x4   :  { %10 = vsyncpa [#allocation3], 0  ;;  %1818 = vmatprep.subr.mxu1 %v2041_v2  ;;  %1809 = vmatprep.subr.mxu0 %v2033_v1  ;;  %vm35_vm0 = vcmask 130048   ;;  %v2073_v7 = vld [vmem:[%s2356_s1] sm:$0xff]  ;;  %v2082_v10 = vld [vmem:[%s2357_s2 + $0x8] sm:$0xff]  ;;  %v34_v28 = vmul.f32 %v2046_v3, %v2051_v4  ;;  %s1987_s12 = smov 96  }
   0x5   :  { %1819 = vmatpush3.msra.mxu1 %v2041_v2  ;;  %1810 = vmatpush3.msra.mxu0 %v2033_v1  ;;  %v33_v9 = vmul.f32 %v2073_v7, %v2028_v0  ;;  %v2087_v11 = vld [vmem:[%s2357_s2] sm:$0xff]  ;;  %v2120_v34 = vld [vmem:[%s2359_s4 + $0x8] sm:$0xff]  ;;  %s1988_s13 = smov 64   ;;  %s1990_s14 = smov 48   ;;  %vm1680_vm1 = vcmask 261120   ;;  %vm1683_vm2 = vcmask 392192  }
   0x6   :  { %133 = vrot.lane.b32.xlu0 %v2051_v4, %s1985_s22  ;;  %1811 = vmatprep.subr.mxu0 %v2041_v2  ;;  %v2125_v36 = vld [vmem:[%s2359_s4] sm:$0xff]  ;;  %s1989_s4 = smov 80   ;;  %s1991_s17 = smov 32   ;;  %vm1686_vm3 = vcmask 523264  }
   0x7   :  { %1812 = vmatpush3.msra.mxu0 %v2041_v2  ;;  %1813 = vmatprep.mubr.msk.f32.mxu0 %vm35_vm0, %v2028_v0 }
   0x8   :  { %1814 = vmatmul.mubr.msk.f32.vlgmr.msra.gmra.mxu0 %vm35_vm0, %v2051_v4 }
   0xa   :  { %123 = vrot.lane.b32.xlu0 %v2073_v7, %s1986_s29 }
  0x74   :  { %v132_v5 = vpop.permute.xlu0 %131 }
  0x75   :  { %1820 = vmatprep.mubr.msk.f32.mxu1 %vm35_vm0, %v132_v5  ;;  %v2095_v20 = vpop.permute.xlu1 %125 }
  0x76   :  { %v130_v22 = vmul.f32 %v2095_v20, %v2051_v4 }
  0x78   :  { %v134_v6 = vpop.permute.xlu0 %133 }
  0x79   :  { %1821 = vmatmul.mubr.msk.f32.vlgmr.msra.gmra.mxu1 %vm35_vm0, %v134_v6 }
  0x7c   :  { %v2097_v21 = vpop.permute.xlu0 %123 }
  0x7d   :  { %v129_v25 = vmul.f32 %v2097_v21, %v2028_v0 }
  0xc8   :  { %v1815_v8 = vpop.f32.mrf.mxu0 }
  0xc9   :  { %v118_v29 = vmul.f32 %v1815_v8, %v2082_v10 }
  0xca   :  { %v108_v12 = vpop.f32.mrf.mxu0 }
  0xcb   :  { %v117_v13 = vmul.f32 %v108_v12, %v2087_v11  ;;  %v120_v31 = vadd.f32 %v118_v29, %v34_v28 }
  0xcd   :  { %v119_v16 = vadd.f32 %v117_v13, %v33_v9  ;;  %v227_v33 = vmul.f32 0.25, %v120_v31 }
  0xcf   :  { %v226_v18 = vmul.f32 0.25, %v119_v16 }
  0xd1   :  { %1827 = vmatprep.mubr.msk.f32.mxu0 %vm35_vm0, %v226_v18 }
 0x139   :  { %v1822_v14 = vpop.f32.mrf.mxu1 }
 0x13a   :  { %v215_v15 = vmul.f32 %v1822_v14, %v2082_v10 }
 0x13b   :  { %v205_v17 = vpop.f32.mrf.mxu1 }
 0x13c   :  { %220 = vrot.lane.b32.xlu1 %v215_v15, %s1986_s29  ;;  %v214_v19 = vmul.f32 %v205_v17, %v2087_v11 }
 0x140   :  { %218 = vrot.lane.b32.xlu1 %v214_v19, %s1986_s29 }
 0x1ae   :  { %v221_v23 = vpop.permute.xlu1 %220 }
 0x1af   :  { %v225_v24 = vadd.f32 %v221_v23, %v130_v22 }
 0x1b1   :  { %232 = vrot.lane.b32.xlu0 %v225_v24, %s1985_s22 }
 0x1b2   :  { %v219_v26 = vpop.permute.xlu1 %218 }
 0x1b3   :  { %v224_v27 = vadd.f32 %v219_v26, %v129_v25 }
 0x1b5   :  { %230 = vrot.lane.b32.xlu1 %v224_v27, %s1985_s22 }
 0x223   :  { %v233_v30 = vpop.permute.xlu0 %232 }
 0x224   :  { %1823 = vmatprep.subr.msk.mxu0 %vm35_vm0, %v233_v30 }
 0x225   :  { %1824 = vmatpush3.xpose.msk.msra.mxu0 %vm35_vm0, %v233_v30 }
 0x227   :  { %v231_v32 = vpop.permute.xlu1 %230 }
 0x228   :  { %1825 = vmatprep.subr.msk.mxu0 %vm35_vm0, %v231_v32 }
 0x229   :  { %1826 = vmatpush3.xpose.msk.msra.mxu0 %vm35_vm0, %v231_v32 }
 0x22a   :  { %1844 = vmatprep.subr.mxu0 %v2033_v1 }
 0x22c   :  { %1828 = vmatmul.mubr.msk.f32.vlgmr.msra.gmra.mxu0 %vm35_vm0, %v227_v33 }
 0x22d   :  { %1845 = vmatpush3.msra.mxu0 %v2033_v1 }
 0x22e   :  { %1846 = vmatprep.subr.mxu0 %v2041_v2 }
 0x22f   :  { %1847 = vmatpush3.msra.mxu0 %v2041_v2 }
 0x2ec   :  { %v1829_v35 = vpop.f32.mrf.mxu0 }
 0x2ed   :  { %v316_v37 = vadd.f32 %v1829_v35, %v2120_v34 }
 0x2ee   :  { %v310_v38 = vpop.f32.mrf.mxu0 }
 0x2ef   :  { %v311_v39 = vadd.f32 %v310_v38, %v2125_v36  ;;  %v322_v40 = vsel %vm35_vm0, %v316_v37, -inf }
 0x2f0   :  { %323 = vmax.xlane.f32.xlu1 %v322_v40 }
 0x2f1   :  { %v319_v41 = vsel %vm35_vm0, %v311_v39, -inf }
 0x2f2   :  { %320 = vmax.xlane.f32.xlu0 %v319_v41 }
 0x301   :  { %343 = vrot.lane.b32.xlu1 %v2051_v4, %s1987_s12 }
 0x305   :  { %539 = vrot.lane.b32.xlu1 %v2028_v0, %s1988_s13 }
 0x309   :  { %541 = vrot.lane.b32.xlu1 %v2051_v4, %s1988_s13 }
 0x30d   :  { %438 = vrot.lane.b32.xlu1 %v2051_v4, %s1989_s4 }
 0x379   :  { %v324_v42 = vpop.xlane.xlu1 %323 }
 0x37a   :  { %v326_v43 = vsub.f32 %v316_v37, %v324_v42 }
 0x37b   :  { %v321_v44 = vpop.xlane.xlu0 %320 }
 0x37c   :  { %v329_v45 = vmul.f32 1.442695, %v326_v43  ;;  %v325_v46 = vsub.f32 %v311_v39, %v321_v44  ;;  %v2195_v44 = vld [vmem:[%s2355_s0 + $0x18] sm:$0xff] }
 0x37d   :  { %v344_v48 = vpop.permute.xlu1 %343 }
 0x37e   :  { %1931 = vpow2.f32 %v329_v45  ;;  %v327_v47 = vmul.f32 1.442695, %v325_v46  ;;  %1830 = vmatprep.subr.mxu1 %v344_v48 }
 0x37f   :  { %1831 = vmatpush3.msra.mxu1 %v344_v48 }
 0x380   :  { %1933 = vpow2.f32 %v327_v47 }
 0x381   :  { %v540_v53 = vpop.permute.xlu1 %539 }
 0x382   :  { %1848 = vmatprep.mubr.msk.f32.mxu0 %vm35_vm0, %v540_v53 }
 0x385   :  { %v542_v54 = vpop.permute.xlu1 %541 }
 0x386   :  { %1849 = vmatmul.mubr.msk.f32.vlgmr.msra.gmra.mxu0 %vm35_vm0, %v542_v54 }
 0x389   :  { %v439_v63 = vpop.permute.xlu1 %438 }
 0x38b   :  { %v1932_v49 = vpop.eup %1931 }
 0x38c   :  { %v334_v50 = vsel %vm35_vm0, %v1932_v49, 0.0 }
 0x38d   :  { %v1934_v51 = vpop.eup %1933  ;;  %335 = vadd.xlane.f32.xlu0 %v334_v50 }
 0x38e   :  { %v331_v52 = vsel %vm35_vm0, %v1934_v51, 0.0 }
 0x391   :  { %332 = vadd.xlane.f32.xlu0 %v331_v52 }
 0x3a7   :  { %341 = vrot.lane.b32.xlu0 %v2028_v0, %s1987_s12 }
 0x3ab   :  { %436 = vrot.lane.b32.xlu0 %v2028_v0, %s1989_s4 }
 0x3af   :  { %533 = vrot.lane.b32.xlu0 %v2046_v3, %s1988_s13 }
 0x3b3   :  { %531 = vrot.lane.b32.xlu0 %v2073_v7, %s1988_s13 }
 0x3b7   :  { %430 = vrot.lane.b32.xlu0 %v2046_v3, %s1990_s14 }
 0x416   :  { %v336_v55 = vpop.xlane.xlu0 %335 }
 0x417   :  { %1935 = vrcp.f32 %v336_v55 }
 0x41a   :  { %v333_v56 = vpop.xlane.xlu0 %332 }
 0x41b   :  { %1937 = vrcp.f32 %v333_v56 }
 0x41e   :  { %v342_v57 = vpop.permute.xlu0 %341 }
 0x41f   :  { %1832 = vmatprep.subr.mxu1 %v342_v57 }
 0x420   :  { %1833 = vmatpush3.msra.mxu1 %v342_v57 }
 0x421   :  { %1837 = vmatprep.subr.mxu1 %v2033_v1 }
 0x422   :  { %v437_v62 = vpop.permute.xlu0 %436 }
 0x424   :  { %v1936_v58 = vpop.eup %1935 }
 0x425   :  { %v340_v61 = vmul.f32 %v1936_v58, %v1932_v49 }
 0x426   :  { %v534_v13 = vpop.permute.xlu0 %533 }
 0x427   :  { %v538_v24 = vmul.f32 %v534_v13, %v2051_v4 }
 0x428   :  { %v1938_v59 = vpop.eup %1937 }
 0x429   :  { %v339_v60 = vmul.f32 %v1938_v59, %v1934_v51 }
 0x42a   :  { %v532_v16 = vpop.permute.xlu0 %531 }
 0x42b   :  { %1834 = vmatprep.mubr.msk.f32.mxu1 %vm35_vm0, %v339_v60  ;;  %v537_v18 = vmul.f32 %v532_v16, %v2028_v0 }
 0x42c   :  { %1835 = vmatmul.mubr.msk.f32.vlgmr.msra.gmra.mxu1 %vm35_vm0, %v340_v61 }
 0x42d   :  { %1838 = vmatpush3.msra.mxu1 %v2033_v1  ;;  %1841 = vmatprep.mubr.msk.f32.mxu1 %vm35_vm0, %v437_v62 }
 0x42e   :  { %1839 = vmatprep.subr.mxu1 %v2041_v2  ;;  %v431_v29 = vpop.permute.xlu0 %430 }
 0x42f   :  { %1840 = vmatpush3.msra.mxu1 %v2041_v2  ;;  %v435_v30 = vmul.f32 %v431_v29, %v2051_v4 }
 0x430   :  { %1842 = vmatmul.mubr.msk.f32.vlgmr.msra.gmra.mxu1 %vm35_vm0, %v439_v63 }
 0x446   :  { %v1850_v5 = vpop.f32.mrf.mxu0 }
 0x447   :  { %v623_v6 = vmul.f32 %v1850_v5, %v2082_v10  ;;  %v2218_v5 = vld [vmem:[%s2355_s0 + $0x8] sm:$0xff]  ;;  %s1992_s0 = smov [#allocation2]  }
 0x448   :  { %v613_v8 = vpop.f32.mrf.mxu0  ;;  %s1694_s20 = sshll.u32 %s1992_s0, 4  ;;  %s1695_s20 = int_to_ptr.vmem [resolvable:$true] %s1694_s20 }
 0x449   :  { %628 = vrot.lane.b32.xlu1 %v623_v6, %s1988_s13  ;;  %v622_v9 = vmul.f32 %v613_v8, %v2087_v11  ;;  %s1963_s21 = scalar_lea.vmem %s1695_s20, 256  ;;  %p1968_p1 = scmp.lt.s32.totalorder %s1695_s20, %s1695_s20 }
 0x44a   :  { %p1964_p0 = scmp.ne.s32.totalorder %s1695_s20, %s1963_s21  ;;  %p1969_p2 = scmp.lt.s32.totalorder %s1963_s21, %s1963_s21 }
 0x44c   :  { %p1970_p3 = por %p1969_p2, %p1968_p1 }
 0x44d   :  { %428 = vrot.lane.b32.xlu1 %v2073_v7, %s1990_s14 }
 0x44e   :  { %p1971_p4 = pnand %p1970_p3, %p1964_p0 }
 0x451   :  { %626 = vrot.lane.b32.xlu1 %v622_v9, %s1988_s13 }
 0x4bb   :  { %v629_v12 = vpop.permute.xlu1 %628 }
 0x4bc   :  { %v633_v28 = vadd.f32 %v629_v12, %v538_v24 }
 0x4bf   :  { %v429_v14 = vpop.permute.xlu1 %428 }
 0x4c0   :  { %v434_v32 = vmul.f32 %v429_v14, %v2028_v0 }
 0x4c3   :  { %v627_v22 = vpop.permute.xlu1 %626 }
 0x4c4   :  { %v632_v27 = vadd.f32 %v627_v22, %v537_v18 }
 0x4ec   :  { %v2167_v15 = vpop.f32.mrf.mxu1 }
 0x4ee   :  { %v2169_v17 = vpop.f32.mrf.mxu1 }
 0x4f0   :  { %v1843_v19 = vpop.f32.mrf.mxu1 }
 0x4f1   :  { %v520_v23 = vmul.f32 %v1843_v19, %v2082_v10 }
 0x4f2   :  { %v510_v25 = vpop.f32.mrf.mxu1 }
 0x4f3   :  { %v519_v26 = vmul.f32 %v510_v25, %v2087_v11  ;;  %525 = vrot.lane.b32.xlu1 %v520_v23, %s1990_s14 }
 0x4f5   :  { %523 = vrot.lane.b32.xlu0 %v519_v26, %s1990_s14 }
 0x4f7   :  { %644 = vrot.lane.b32.xlu1 %v632_v27, %s1988_s13 }
 0x4f9   :  { %646 = vrot.lane.b32.xlu0 %v633_v28, %s1988_s13 }
 0x565   :  { %v526_v31 = vpop.permute.xlu1 %525 }
 0x566   :  { %v530_v33 = vadd.f32 %v526_v31, %v435_v30 }
 0x567   :  { %v524_v35 = vpop.permute.xlu0 %523 }
 0x568   :  { %v635_v37 = vmul.f32 0.25, %v530_v33  ;;  %v529_v38 = vadd.f32 %v524_v35, %v434_v32 }
 0x569   :  { %v645_v41 = vpop.permute.xlu1 %644 }
 0x56a   :  { %v634_v39 = vmul.f32 0.25, %v529_v38  ;;  %640 = vrot.lane.b32.xlu1 %v635_v37, %s1989_s4 }
 0x56b   :  { %v647_v40 = vpop.permute.xlu0 %646 }
 0x56c   :  { %638 = vrot.lane.b32.xlu0 %v634_v39, %s1989_s4  ;;  %1851 = vmatprep.subr.msk.mxu1 %vm35_vm0, %v647_v40 }
 0x56d   :  { %1852 = vmatpush3.xpose.msk.msra.mxu1 %vm35_vm0, %v647_v40 }
 0x56e   :  { %1853 = vmatprep.subr.msk.mxu1 %vm35_vm0, %v645_v41 }
 0x571   :  { %1854 = vmatpush3.xpose.msk.msra.mxu1 %vm35_vm0, %v645_v41 }
 0x572   :  { %1872 = vmatprep.subr.mxu1 %v2033_v1 }
 0x5dc   :  { %v641_v43 = vpop.permute.xlu1 %640 }
 0x5de   :  { %v639_v42 = vpop.permute.xlu0 %638 }
 0x5df   :  { %1855 = vmatprep.mubr.msk.f32.mxu1 %vm35_vm0, %v639_v42 }
 0x5e0   :  { %1856 = vmatmul.mubr.msk.f32.vlgmr.msra.gmra.mxu1 %vm35_vm0, %v641_v43 }
 0x5e1   :  { %1873 = vmatpush3.msra.mxu1 %v2033_v1 }
 0x5e2   :  { %1874 = vmatprep.subr.mxu1 %v2041_v2 }
 0x5e3   :  { %1875 = vmatpush3.msra.mxu1 %v2041_v2 }
 0x5e4   :  { %1886 = vmatprep.subr.mxu1 %v2195_v44 }
 0x6a0   :  { %v1857_v45 = vpop.f32.mrf.mxu1 }
 0x6a1   :  { %v728_v46 = vadd.f32 %v1857_v45, %v2120_v34 }
 0x6a2   :  { %v722_v47 = vpop.f32.mrf.mxu1 }
 0x6a3   :  { %v723_v48 = vadd.f32 %v722_v47, %v2125_v36  ;;  %v734_v49 = vsel %vm35_vm0, %v728_v46, -inf }
 0x6a4   :  { %735 = vmax.xlane.f32.xlu1 %v734_v49 }
 0x6a5   :  { %v731_v50 = vsel %vm35_vm0, %v723_v48, -inf }
 0x6a6   :  { %732 = vmax.xlane.f32.xlu0 %v731_v50 }
 0x6b5   :  { %755 = vrot.lane.b32.xlu1 %v2051_v4, %s1990_s14 }
 0x6b9   :  { %951 = vrot.lane.b32.xlu1 %v2028_v0, %s1986_s29 }
 0x6bd   :  { %953 = vrot.lane.b32.xlu1 %v2051_v4, %s1986_s29 }
 0x6c1   :  { %850 = vrot.lane.b32.xlu1 %v2051_v4, %s1991_s17 }
 0x72d   :  { %v736_v51 = vpop.xlane.xlu1 %735 }
 0x72e   :  { %v738_v52 = vsub.f32 %v728_v46, %v736_v51 }
 0x72f   :  { %v733_v53 = vpop.xlane.xlu0 %732 }
 0x730   :  { %v741_v54 = vmul.f32 1.442695, %v738_v52  ;;  %v737_v55 = vsub.f32 %v723_v48, %v733_v53 }
 0x731   :  { %v756_v56 = vpop.permute.xlu1 %755 }
 0x732   :  { %1939 = vpow2.f32 %v741_v54  ;;  %v739_v57 = vmul.f32 1.442695, %v737_v55  ;;  %1858 = vmatprep.subr.mxu0 %v756_v56 }
 0x733   :  { %1859 = vmatpush3.msra.mxu0 %v756_v56 }
 0x734   :  { %1941 = vpow2.f32 %v739_v57 }
 0x735   :  { %v952_v62 = vpop.permute.xlu1 %951 }
 0x736   :  { %1876 = vmatprep.mubr.msk.f32.mxu1 %vm35_vm0, %v952_v62 }
 0x739   :  { %v954_v63 = vpop.permute.xlu1 %953 }
 0x73a   :  { %1877 = vmatmul.mubr.msk.f32.vlgmr.msra.gmra.mxu1 %vm35_vm0, %v954_v63 }
 0x73b   :  { %1887 = vmatpush3.msra.mxu1 %v2195_v44 }
 0x73c   :  { %1888 = vmatprep.subr.mxu1 %v2218_v5 }
 0x73d   :  { %1889 = vmatpush3.msra.mxu1 %v2218_v5  ;;  %v851_v19 = vpop.permute.xlu1 %850 }
 0x73e   :  { %1893 = vmatprep.subr.mxu1 %v2033_v1 }
 0x73f   :  { %v1940_v58 = vpop.eup %1939 }
 0x740   :  { %v746_v59 = vsel %vm35_vm0, %v1940_v58, 0.0 }
 0x741   :  { %v1942_v60 = vpop.eup %1941  ;;  %747 = vadd.xlane.f32.xlu0 %v746_v59 }
 0x742   :  { %v743_v61 = vsel %vm35_vm0, %v1942_v60, 0.0 }
 0x745   :  { %744 = vadd.xlane.f32.xlu0 %v743_v61 }
 0x75b   :  { %753 = vrot.lane.b32.xlu0 %v2028_v0, %s1990_s14 }
 0x75f   :  { %848 = vrot.lane.b32.xlu0 %v2028_v0, %s1991_s17 }
 0x763   :  { %945 = vrot.lane.b32.xlu0 %v2046_v3, %s1985_s22 }
 0x767   :  { %943 = vrot.lane.b32.xlu0 %v2073_v7, %s1985_s22 }
 0x76b   :  { %842 = vrot.lane.b32.xlu0 %v2046_v3, %s1987_s12 }
 0x7ca   :  { %v748_v6 = vpop.xlane.xlu0 %747 }
 0x7cb   :  { %1943 = vrcp.f32 %v748_v6 }
 0x7ce   :  { %v745_v8 = vpop.xlane.xlu0 %744 }
 0x7cf   :  { %1945 = vrcp.f32 %v745_v8 }
 0x7d2   :  { %v754_v9 = vpop.permute.xlu0 %753 }
 0x7d3   :  { %1860 = vmatprep.subr.mxu0 %v754_v9 }
 0x7d4   :  { %1861 = vmatpush3.msra.mxu0 %v754_v9 }
 0x7d5   :  { %1865 = vmatprep.subr.mxu0 %v2033_v1 }
 0x7d6   :  { %v849_v18 = vpop.permute.xlu0 %848 }
 0x7d8   :  { %v1944_v12 = vpop.eup %1943 }
 0x7d9   :  { %v752_v16 = vmul.f32 %v1944_v12, %v1940_v58 }
 0x7da   :  { %v946_v27 = vpop.permute.xlu0 %945 }
 0x7db   :  { %v950_v38 = vmul.f32 %v946_v27, %v2051_v4 }
 0x7dc   :  { %v1946_v13 = vpop.eup %1945 }
 0x7dd   :  { %v751_v14 = vmul.f32 %v1946_v13, %v1942_v60 }
 0x7de   :  { %v944_v30 = vpop.permute.xlu0 %943 }
 0x7df   :  { %1862 = vmatprep.mubr.msk.f32.mxu0 %vm35_vm0, %v751_v14  ;;  %v949_v32 = vmul.f32 %v944_v30, %v2028_v0 }
 0x7e0   :  { %1863 = vmatmul.mubr.msk.f32.vlgmr.msra.gmra.mxu0 %vm35_vm0, %v752_v16 }
 0x7e1   :  { %1866 = vmatpush3.msra.mxu0 %v2033_v1  ;;  %1869 = vmatprep.mubr.msk.f32.mxu0 %vm35_vm0, %v849_v18 }
 0x7e2   :  { %1867 = vmatprep.subr.mxu0 %v2041_v2  ;;  %v843_v43 = vpop.permute.xlu0 %842 }
 0x7e3   :  { %1868 = vmatpush3.msra.mxu0 %v2041_v2  ;;  %v847_v45 = vmul.f32 %v843_v43, %v2051_v4 }
 0x7e4   :  { %1870 = vmatmul.mubr.msk.f32.vlgmr.msra.gmra.mxu0 %vm35_vm0, %v851_v19 }
 0x7fa   :  { %v1878_v22 = vpop.f32.mrf.mxu1 }
 0x7fb   :  { %v1035_v23 = vmul.f32 %v1878_v22, %v2082_v10 }
 0x7fc   :  { %v1025_v24 = vpop.f32.mrf.mxu1 }
 0x7fd   :  { %1040 = vrot.lane.b32.xlu1 %v1035_v23, %s1985_s22  ;;  %v1034_v25 = vmul.f32 %v1025_v24, %v2087_v11 }
 0x801   :  { %840 = vrot.lane.b32.xlu1 %v2073_v7, %s1987_s12 }
 0x805   :  { %1038 = vrot.lane.b32.xlu1 %v1034_v25, %s1985_s22 }
 0x86f   :  { %v1041_v26 = vpop.permute.xlu1 %1040 }
 0x870   :  { %v1045_v42 = vadd.f32 %v1041_v26, %v950_v38 }
 0x873   :  { %v841_v28 = vpop.permute.xlu1 %840 }
 0x874   :  { %v846_v47 = vmul.f32 %v841_v28, %v2028_v0 }
 0x877   :  { %v1039_v35 = vpop.permute.xlu1 %1038 }
 0x878   :  { %v1044_v41 = vadd.f32 %v1039_v35, %v949_v32 }
 0x8a0   :  { %v2248_v29 = vpop.f32.mrf.mxu0 }
 0x8a2   :  { %v2250_v31 = vpop.f32.mrf.mxu0 }
 0x8a4   :  { %v1871_v33 = vpop.f32.mrf.mxu0 }
 0x8a5   :  { %v932_v37 = vmul.f32 %v1871_v33, %v2082_v10 }
 0x8a6   :  { %v922_v39 = vpop.f32.mrf.mxu0 }
 0x8a7   :  { %v931_v40 = vmul.f32 %v922_v39, %v2087_v11  ;;  %937 = vrot.lane.b32.xlu1 %v932_v37, %s1987_s12 }
 0x8a9   :  { %935 = vrot.lane.b32.xlu0 %v931_v40, %s1987_s12 }
 0x8ab   :  { %1056 = vrot.lane.b32.xlu1 %v1044_v41, %s1986_s29 }
 0x8ad   :  { %1058 = vrot.lane.b32.xlu0 %v1045_v42, %s1986_s29 }
 0x919   :  { %v938_v46 = vpop.permute.xlu1 %937 }
 0x91a   :  { %v942_v48 = vadd.f32 %v938_v46, %v847_v45 }
 0x91b   :  { %v936_v49 = vpop.permute.xlu0 %935 }
 0x91c   :  { %v1047_v50 = vmul.f32 0.25, %v942_v48  ;;  %v941_v51 = vadd.f32 %v936_v49, %v846_v47  ;;  %v1246_v49 = vmul.f32 %v2097_v21, %v2218_v5 }
 0x91d   :  { %v1057_v54 = vpop.permute.xlu1 %1056 }
 0x91e   :  { %v1046_v52 = vmul.f32 0.25, %v941_v51  ;;  %1052 = vrot.lane.b32.xlu1 %v1047_v50, %s1991_s17 }
 0x91f   :  { %v1059_v53 = vpop.permute.xlu0 %1058 }
 0x920   :  { %1050 = vrot.lane.b32.xlu0 %v1046_v52, %s1991_s17  ;;  %1879 = vmatprep.subr.msk.mxu0 %vm35_vm0, %v1059_v53 }
 0x921   :  { %1880 = vmatpush3.xpose.msk.msra.mxu0 %vm35_vm0, %v1059_v53 }
 0x922   :  { %1881 = vmatprep.subr.msk.mxu0 %vm35_vm0, %v1057_v54 }
 0x925   :  { %1882 = vmatpush3.xpose.msk.msra.mxu0 %vm35_vm0, %v1057_v54 }
 0x926   :  { %1900 = vmatprep.subr.mxu0 %v2033_v1 }
 0x990   :  { %v1053_v4 = vpop.permute.xlu1 %1052 }
 0x992   :  { %v1051_v0 = vpop.permute.xlu0 %1050 }
 0x993   :  { %1883 = vmatprep.mubr.msk.f32.mxu0 %vm35_vm0, %v1051_v0 }
 0x994   :  { %1884 = vmatmul.mubr.msk.f32.vlgmr.msra.gmra.mxu0 %vm35_vm0, %v1053_v4 }
 0x995   :  { %1901 = vmatpush3.msra.mxu0 %v2033_v1 }
 0x996   :  { %1902 = vmatprep.subr.mxu0 %v2041_v2 }
 0x997   :  { %1903 = vmatpush3.msra.mxu0 %v2041_v2 }
 0xa54   :  { %v1885_v55 = vpop.f32.mrf.mxu0 }
 0xa55   :  { %v1140_v56 = vadd.f32 %v1885_v55, %v2120_v34 }
 0xa56   :  { %v1134_v57 = vpop.f32.mrf.mxu0 }
 0xa57   :  { %v1135_v58 = vadd.f32 %v1134_v57, %v2125_v36  ;;  %v1146_v59 = vsel %vm35_vm0, %v1140_v56, -inf }
 0xa58   :  { %1147 = vmax.xlane.f32.xlu1 %v1146_v59 }
 0xa59   :  { %v1143_v60 = vsel %vm35_vm0, %v1135_v58, -inf }
 0xa5a   :  { %1144 = vmax.xlane.f32.xlu0 %v1143_v60 }
 0xa69   :  { %1353 = vrot.lane.b32.xlu1 %v2218_v5, %s1987_s12 }
 0xa6d   :  { %1250 = vrot.lane.b32.xlu1 %v2218_v5, %s1985_s22 }
 0xa71   :  { %1252 = vrot.lane.b32.xlu1 %v2195_v44, %s1985_s22 }
 0xae1   :  { %v1148_v61 = vpop.xlane.xlu1 %1147 }
 0xae2   :  { %v1150_v62 = vsub.f32 %v1140_v56, %v1148_v61 }
 0xae3   :  { %v1145_v63 = vpop.xlane.xlu0 %1144 }
 0xae4   :  { %v1153_v6 = vmul.f32 1.442695, %v1150_v62  ;;  %v1149_v8 = vsub.f32 %v1135_v58, %v1145_v63 }
 0xae5   :  { %v1354_v18 = vpop.permute.xlu1 %1353 }
 0xae6   :  { %1947 = vpow2.f32 %v1153_v6  ;;  %v1151_v9 = vmul.f32 1.442695, %v1149_v8  ;;  %1904 = vmatprep.mubr.msk.f32.mxu0 %vm35_vm0, %v1354_v18 }
 0xae8   :  { %1949 = vpow2.f32 %v1151_v9 }
 0xae9   :  { %v1251_v25 = vpop.permute.xlu1 %1250 }
 0xaf3   :  { %v1948_v12 = vpop.eup %1947 }
 0xaf4   :  { %v1158_v13 = vsel %vm35_vm0, %v1948_v12, 0.0 }
 0xaf5   :  { %v1950_v14 = vpop.eup %1949  ;;  %1159 = vadd.xlane.f32.xlu0 %v1158_v13 }
 0xaf6   :  { %v1155_v16 = vsel %vm35_vm0, %v1950_v14, 0.0 }
 0xaf9   :  { %1156 = vadd.xlane.f32.xlu0 %v1155_v16 }
 0xb0f   :  { %1355 = vrot.lane.b32.xlu0 %v2195_v44, %s1987_s12 }
 0xb13   :  { %1347 = vrot.lane.b32.xlu0 %v2046_v3, %s1991_s17  ;;  %v1253_v3 = vpop.permute.xlu1 %1252 }
 0xb17   :  { %1345 = vrot.lane.b32.xlu0 %v2073_v7, %s1991_s17 }
 0xb7e   :  { %v1160_v19 = vpop.xlane.xlu0 %1159 }
 0xb7f   :  { %1951 = vrcp.f32 %v1160_v19 }
 0xb82   :  { %v1157_v22 = vpop.xlane.xlu0 %1156 }
 0xb83   :  { %1953 = vrcp.f32 %v1157_v22 }
 0xb86   :  { %v1356_v23 = vpop.permute.xlu0 %1355 }
 0xb87   :  { %1905 = vmatmul.mubr.msk.f32.vlgmr.msra.gmra.mxu0 %vm35_vm0, %v1356_v23 }
 0xb8a   :  { %v1348_v40 = vpop.permute.xlu0 %1347 }
 0xb8b   :  { %v1352_v41 = vmul.f32 %v1348_v40, %v2195_v44 }
 0xb8c   :  { %v1952_v24 = vpop.eup %1951 }
 0xb8d   :  { %v1164_v28 = vmul.f32 %v1952_v24, %v1948_v12 }
 0xb8e   :  { %v1346_v42 = vpop.permute.xlu0 %1345 }
 0xb8f   :  { %v1351_v46 = vmul.f32 %v1346_v42, %v2218_v5 }
 0xb90   :  { %v1954_v26 = vpop.eup %1953 }
 0xb91   :  { %v1163_v27 = vmul.f32 %v1954_v26, %v1950_v14 }
 0xb93   :  { %1890 = vmatprep.mubr.msk.f32.mxu1 %vm35_vm0, %v1163_v27 }
 0xb94   :  { %1891 = vmatmul.mubr.msk.f32.vlgmr.msra.gmra.mxu1 %vm35_vm0, %v1164_v28 }
 0xb95   :  { %1894 = vmatpush3.msra.mxu1 %v2033_v1  ;;  %1897 = vmatprep.mubr.msk.f32.mxu1 %vm35_vm0, %v1251_v25 }
 0xb96   :  { %1895 = vmatprep.subr.mxu1 %v2041_v2 }
 0xb97   :  { %1896 = vmatpush3.msra.mxu1 %v2041_v2 }
 0xb98   :  { %1898 = vmatmul.mubr.msk.f32.vlgmr.msra.gmra.mxu1 %vm35_vm0, %v1253_v3 }
 0xc47   :  { %v1906_v7 = vpop.f32.mrf.mxu0 }
 0xc48   :  { %v1437_v30 = vmul.f32 %v1906_v7, %v2082_v10 }
 0xc49   :  { %v1427_v32 = vpop.f32.mrf.mxu0 }
 0xc4a   :  { %1442 = vrot.lane.b32.xlu1 %v1437_v30, %s1991_s17  ;;  %v1436_v33 = vmul.f32 %v1427_v32, %v2087_v11 }
 0xc4e   :  { %1440 = vrot.lane.b32.xlu1 %v1436_v33, %s1991_s17 }
 0xc54   :  { %v1892_v1 = vpop.f32.mrf.mxu1 }
 0xc56   :  { %v2305_v35 = vpop.f32.mrf.mxu1 }
 0xc58   :  { %v1899_v37 = vpop.f32.mrf.mxu1 }
 0xc59   :  { %v1334_v38 = vmul.f32 %v1899_v37, %v2082_v10  ;;  %v1247_v10 = vmul.f32 %v2095_v20, %v2195_v44 }
 0xc5a   :  { %v1324_v39 = vpop.f32.mrf.mxu1 }
 0xc5b   :  { %v1333_v2 = vmul.f32 %v1324_v39, %v2087_v11  ;;  %1339 = vrot.lane.b32.xlu1 %v1334_v38, %s1986_s29 }
 0xc5d   :  { %1337 = vrot.lane.b32.xlu0 %v1333_v2, %s1986_s29 }
 0xcbc   :  { %v1443_v43 = vpop.permute.xlu1 %1442 }
 0xcbd   :  { %v1447_v45 = vadd.f32 %v1443_v43, %v1352_v41 }
 0xcbf   :  { %1460 = vrot.lane.b32.xlu0 %v1447_v45, %s1987_s12 }
 0xcc0   :  { %v1441_v47 = vpop.permute.xlu1 %1440 }
 0xcc1   :  { %v1446_v48 = vadd.f32 %v1441_v47, %v1351_v46 }
 0xcc3   :  { %1458 = vrot.lane.b32.xlu1 %v1446_v48, %s1987_s12 }
 0xccd   :  { %v1340_v11 = vpop.permute.xlu1 %1339 }
 0xcce   :  { %v1344_v50 = vadd.f32 %v1340_v11, %v1247_v10 }
 0xccf   :  { %v1338_v51 = vpop.permute.xlu0 %1337 }
 0xcd0   :  { %v1449_v52 = vmul.f32 0.25, %v1344_v50  ;;  %v1343_v53 = vadd.f32 %v1338_v51, %v1246_v49 }
 0xcd2   :  { %v1448_v54 = vmul.f32 0.25, %v1343_v53  ;;  %1454 = vrot.lane.b32.xlu1 %v1449_v52, %s1985_s22 }
 0xcd4   :  { %1452 = vrot.lane.b32.xlu0 %v1448_v54, %s1985_s22 }
 0xd31   :  { %v1461_v0 = vpop.permute.xlu0 %1460 }
 0xd32   :  { %1907 = vmatprep.subr.msk.mxu1 %vm35_vm0, %v1461_v0 }
 0xd33   :  { %1908 = vmatpush3.xpose.msk.msra.mxu1 %vm35_vm0, %v1461_v0 }
 0xd35   :  { %v1459_v4 = vpop.permute.xlu1 %1458 }
 0xd36   :  { %1909 = vmatprep.subr.msk.mxu1 %vm35_vm0, %v1459_v4 }
 0xd37   :  { %1910 = vmatpush3.xpose.msk.msra.mxu1 %vm35_vm0, %v1459_v4 }
 0xd44   :  { %v1455_v21 = vpop.permute.xlu1 %1454 }
 0xd46   :  { %v1453_v20 = vpop.permute.xlu0 %1452 }
 0xd47   :  { %1911 = vmatprep.mubr.msk.f32.mxu1 %vm35_vm0, %v1453_v20 }
 0xd48   :  { %1912 = vmatmul.mubr.msk.f32.vlgmr.msra.gmra.mxu1 %vm35_vm0, %v1455_v21 }
 0xe08   :  { %v1913_v55 = vpop.f32.mrf.mxu1 }
 0xe09   :  { %v1542_v56 = vadd.f32 %v1913_v55, %v2120_v34 }
 0xe0a   :  { %v1536_v57 = vpop.f32.mrf.mxu1 }
 0xe0b   :  { %v1537_v58 = vadd.f32 %v1536_v57, %v2125_v36  ;;  %v1548_v59 = vsel %vm35_vm0, %v1542_v56, -inf }
 0xe0c   :  { %1549 = vmax.xlane.f32.xlu1 %v1548_v59 }
 0xe0d   :  { %v1545_v60 = vsel %vm35_vm0, %v1537_v58, -inf }
 0xe0e   :  { %1546 = vmax.xlane.f32.xlu0 %v1545_v60 }
 0xe1d   :  { %1569 = vrot.lane.b32.xlu1 %v2195_v44, %s1989_s4 }
 0xe21   :  { %1656 = vrot.lane.b32.xlu1 %v2250_v31, %s1986_s29 }
 0xe25   :  { %1658 = vrot.lane.b32.xlu1 %v2248_v29, %s1986_s29 }
 0xe29   :  { %1666 = vrot.lane.b32.xlu1 %v1892_v1, %s1991_s17 }
 0xe95   :  { %v1550_v34 = vpop.xlane.xlu1 %1549 }
 0xe96   :  { %v1552_v61 = vsub.f32 %v1542_v56, %v1550_v34 }
 0xe97   :  { %v1547_v36 = vpop.xlane.xlu0 %1546 }
 0xe98   :  { %v1555_v62 = vmul.f32 1.442695, %v1552_v61  ;;  %v1551_v63 = vsub.f32 %v1537_v58, %v1547_v36 }
 0xe99   :  { %v1570_v6 = vpop.permute.xlu1 %1569 }
 0xe9a   :  { %1955 = vpow2.f32 %v1555_v62  ;;  %v1553_v8 = vmul.f32 1.442695, %v1551_v63  ;;  %1914 = vmatprep.subr.mxu0 %v1570_v6 }
 0xe9b   :  { %1915 = vmatpush3.msra.mxu0 %v1570_v6 }
 0xe9c   :  { %1957 = vpow2.f32 %v1553_v8 }
 0xe9d   :  { %v1657_v24 = vpop.permute.xlu1 %1656 }
 0xe9e   :  { %v1678_v30 = vsel %vm35_vm0, %v2169_v17, %v1657_v24 }
 0xea1   :  { %v1659_v25 = vpop.permute.xlu1 %1658 }
 0xea2   :  { %v1679_v28 = vsel %vm35_vm0, %v2167_v15, %v1659_v25 }
 0xea5   :  { %v1667_v26 = vpop.permute.xlu1 %1666 }
 0xea6   :  { %v1682_v3 = vsel %vm1680_vm1, %v1679_v28, %v1667_v26 }
 0xea7   :  { %v1956_v44 = vpop.eup %1955 }
 0xea8   :  { %v1560_v9 = vsel %vm35_vm0, %v1956_v44, 0.0 }
 0xea9   :  { %v1958_v31 = vpop.eup %1957  ;;  %1561 = vadd.xlane.f32.xlu0 %v1560_v9 }
 0xeaa   :  { %v1557_v29 = vsel %vm35_vm0, %v1958_v31, 0.0 }
 0xead   :  { %1558 = vadd.xlane.f32.xlu0 %v1557_v29 }
 0xec3   :  { %1567 = vrot.lane.b32.xlu0 %v2218_v5, %s1989_s4 }
 0xec7   :  { %1664 = vrot.lane.b32.xlu0 %v2305_v35, %s1991_s17 }
 0xf32   :  { %v1562_v12 = vpop.xlane.xlu0 %1561 }
 0xf33   :  { %1959 = vrcp.f32 %v1562_v12 }
 0xf36   :  { %v1559_v13 = vpop.xlane.xlu0 %1558 }
 0xf37   :  { %1961 = vrcp.f32 %v1559_v13 }
 0xf3a   :  { %v1568_v14 = vpop.permute.xlu0 %1567 }
 0xf3b   :  { %1916 = vmatprep.subr.mxu0 %v1568_v14 }
 0xf3c   :  { %1917 = vmatpush3.msra.mxu0 %v1568_v14 }
 0xf3e   :  { %v1665_v27 = vpop.permute.xlu0 %1664 }
 0xf3f   :  { %v1681_v33 = vsel %vm1680_vm1, %v1678_v30, %v1665_v27 }
 0xf40   :  { %v1960_v16 = vpop.eup %1959 }
 0xf41   :  { %v1566_v22 = vmul.f32 %v1960_v16, %v1956_v44 }
 0xf44   :  { %v1962_v18 = vpop.eup %1961 }
 0xf45   :  { %v1565_v19 = vmul.f32 %v1962_v18, %v1958_v31 }
 0xf47   :  { %1918 = vmatprep.mubr.msk.f32.mxu0 %vm35_vm0, %v1565_v19 }
 0xf48   :  { %1919 = vmatmul.mubr.msk.f32.vlgmr.msra.gmra.mxu0 %vm35_vm0, %v1566_v22 }
0x1008   :  { %v1920_v23 = vpop.f32.mrf.mxu0 }
0x1009   :  { %1674 = vrot.lane.b32.xlu1 %v1920_v23, %s1990_s14 }
0x100a   :  { %v1645_v5 = vpop.f32.mrf.mxu0 }
0x100b   :  { %1672 = vrot.lane.b32.xlu0 %v1645_v5, %s1990_s14 }
0x107b   :  { %v1675_v7 = vpop.permute.xlu1 %1674 }
0x107c   :  { %v1685_v32 = vsel %vm1683_vm2, %v1682_v3, %v1675_v7 }
0x107d   :  { %1688 = vst.msk [vmem:[#allocation2 + $0x8] sm:$0xff] %vm1686_vm3, %v1685_v32  ;;  %v1673_v1 = vpop.permute.xlu0 %1672 }
0x107e   :  { %v1684_v35 = vsel %vm1683_vm2, %v1681_v33, %v1673_v1 }
0x107f   :  { %1687 = vst.msk [vmem:[#allocation2] sm:$0xff] %vm1686_vm3, %v1684_v35 }
0x1080   :  { %1974 = shalt.err (!%p1971_p4)
}
0x1081   :  { %s1993_s22 = smov 128   ;;  %s1994_s23 = smov 8  }
0x1082   :  { %1700 = dma.vmem_to_hbm [thread:$0]  %s1695_s20, 256, %s2360_s5, [#allocation3], %s1993_s22, %s1993_s22, %s1994_s23  }
0x1083   :  { %1983 = dma.done.wait [#allocation3], 256  }
0x1084   :  { %1984 = vsyncadd [#allocation3], 4294967040 }
0x1085   :  { %1704 = vsyncpa [#allocation3], 1 }

</bundles_post_ra>
